<compile_context>
chip_gen: v6e
topology: v6e:2x2x1
jax: 0.10.0
libtpu: 0.0.40
codegen_flags: <defaults>
</compile_context>

<pallas_src>
import functools

import jax
import jax.numpy as jnp
from jax.experimental import pallas as pl
from jax.experimental.pallas import tpu as pltpu

_LANES = 128
_ROW_ALIGN = 16            # sublane alignment (also covers bf16 (16,128) packing)


def _round_up(x, m):
    return ((x + m - 1) // m) * m


def _make_focal_kernel(alpha, gamma, n_valid, block_rows):
    gamma_f = float(gamma)
    gamma_int = int(gamma_f) if (gamma_f >= 0.0 and gamma_f == int(gamma_f)) else None
    alpha_f = float(alpha)

    def kernel(logits_ref, targets_ref, out_ref):
        pid = pl.program_id(0)

        x = logits_ref[...].astype(jnp.float32)          # (C, R, 128)
        t = targets_ref[...]                             # (R, 128) int32

        # Stable log-sum-exp over the class (leading) axis: elementwise VPU
        # work across C slabs; one exp per class on the EUP.
        m3 = jnp.max(x, axis=0, keepdims=True)           # (1, R, 128)
        e = jnp.exp(x - m3)                              # (C, R, 128)
        denom = jnp.sum(e, axis=0)                       # (R, 128)

        # Gather the target class with a select feeding the class reduction.
        class_ids = jax.lax.broadcasted_iota(jnp.int32, x.shape, 0)
        sel = class_ids == t[None, :, :]
        x_t = jnp.sum(jnp.where(sel, x, 0.0), axis=0)    # (R, 128)
        e_t = jnp.sum(jnp.where(sel, e, 0.0), axis=0)    # (R, 128)

        m = m3[0]                                        # (R, 128)
        log_p = (x_t - m) - jnp.log(denom)
        # p from the already-computed shifted exponentials (no second exp);
        # approximate reciprocal runs on the EUP slot and is nearly free.
        p = e_t * pl.reciprocal(denom, approx=True)

        one_minus_p = 1.0 - p
        if gamma_int is not None:
            # (1 - p)^gamma as repeated multiply: VPU work, frees the EUP.
            w = jnp.ones_like(one_minus_p)
            for _ in range(gamma_int):
                w = w * one_minus_p
        else:
            w = jnp.power(one_minus_p, gamma_f)

        loss = (-alpha_f) * w * log_p                    # (R, 128)

        # Mask padded batch positions (layout padding + ragged last block).
        rows = jax.lax.broadcasted_iota(jnp.int32, loss.shape, 0)
        lanes = jax.lax.broadcasted_iota(jnp.int32, loss.shape, 1)
        batch_idx = (pid * block_rows + rows) * _LANES + lanes
        loss = jnp.where(batch_idx < n_valid, loss, 0.0)

        # Per-tile partial sum kept as a full (8, 128) vreg: tile-aligned
        # reshape + leading-axis VPU adds; no per-step scalar RMW and no
        # per-step cross-lane reduction.
        partial = jnp.sum(loss.reshape(block_rows // 8, 8, _LANES), axis=0)
        out_ref[0] = partial

    return kernel


def focal_loss(inputs, targets, alpha=0.25, gamma=2.0, size_average=True,
               max_block_rows=None,
               target_step_bytes=4 * 1024 * 1024,
               vmem_block_budget=12 * 1024 * 1024):
    """Focal loss forward. inputs: (N, C) logits; targets: (N,) int labels."""
    n, c = inputs.shape
    esize = jnp.dtype(inputs.dtype).itemsize

    # Pad the batch to a multiple of 16*128 so the (C, R, 128) layout is
    # sublane-aligned; this pad fuses with the transpose+reshape copy below.
    n_pad = _round_up(max(n, 1), _ROW_ALIGN * _LANES)
    r_total = n_pad // _LANES

    # Lane-dense, sublane-dense layout (single fused XLA copy under jit).
    logits3 = jnp.pad(inputs, ((0, n_pad - n), (0, 0))).T.reshape(c, r_total, _LANES)
    targets2 = jnp.pad(targets.astype(jnp.int32), (0, n_pad - n)).reshape(r_total, _LANES)

    # Tile rows: big enough (>= ~4 MiB moved per step) to amortize per-step
    # overhead, small enough for a double-buffered VMEM budget.
    bytes_per_row = (c * esize + 4) * _LANES              # logits + int32 targets
    rows_cap_vmem = max(_ROW_ALIGN, vmem_block_budget // (2 * bytes_per_row))
    rows_target = max(_ROW_ALIGN, target_step_bytes // bytes_per_row)
    block_rows = min(rows_cap_vmem, rows_target)
    if max_block_rows is not None:
        block_rows = min(block_rows, int(max_block_rows))
    block_rows = max(_ROW_ALIGN, (block_rows // _ROW_ALIGN) * _ROW_ALIGN)
    block_rows = min(block_rows, r_total)
    num_tiles = pl.cdiv(r_total, block_rows)
    # TODO(synk): very large class counts would need an additional class-axis
    # grid split to stay within the VMEM block budget.

    kernel = _make_focal_kernel(alpha, gamma, n, block_rows)

    partials = pl.pallas_call(
        kernel,
        out_shape=jax.ShapeDtypeStruct((num_tiles, 8, _LANES), jnp.float32),
        grid_spec=pltpu.PrefetchScalarGridSpec(
            num_scalar_prefetch=0,
            grid=(num_tiles,),
            in_specs=[
                pl.BlockSpec((c, block_rows, _LANES), lambda i: (0, i, 0)),
                pl.BlockSpec((block_rows, _LANES), lambda i: (i, 0)),
            ],
            out_specs=pl.BlockSpec((1, 8, _LANES), lambda i: (i, 0, 0)),
        ),
        compiler_params=pltpu.CompilerParams(
            dimension_semantics=("parallel",),
            vmem_limit_bytes=32 * 1024 * 1024,
        ),
    )(logits3, targets2)

    total = jnp.sum(partials)
    if size_average:
        return total / jnp.float32(n)
    return total


def _reference_focal_loss(inputs, targets, alpha=0.25, gamma=2.0,
                          size_average=True):
    p_full = jax.nn.softmax(inputs.astype(jnp.float32), axis=1)
    p = jnp.take_along_axis(p_full, targets[:, None].astype(jnp.int32), axis=1)
    batch_loss = -alpha * jnp.power(1.0 - p, gamma) * jnp.log(p)
    return jnp.mean(batch_loss) if size_average else jnp.sum(batch_loss)


if __name__ == "__main__":
    key = jax.random.PRNGKey(0)
    k1, k2, k3, k4 = jax.random.split(key, 4)

    # Case 1: module defaults (class_num=2, alpha=0.25, gamma=2, mean).
    # Jitted wrapper so pad+transpose+reshape fuse into a single XLA copy.
    N, C = 8, 2
    x = jax.random.normal(k1, (N, C), dtype=jnp.float32)
    t = jax.random.randint(k2, (N,), 0, C, dtype=jnp.int32)
    focal_jit = jax.jit(functools.partial(focal_loss, alpha=0.25, gamma=2.0,
                                          size_average=True))
    loss = focal_jit(x, t)
    jax.block_until_ready(loss)
    ref = _reference_focal_loss(x, t, 0.25, 2.0, True)
    assert jnp.allclose(loss, ref, atol=2e-4, rtol=2e-3), (loss, ref)

    # Case 2: multi-tile "parallel" grid with a ragged last block
    # (48 layout rows, block_rows=32 -> 2 tiles, second one partial).
    N2, C2 = 5000, 3
    x2 = jax.random.normal(k3, (N2, C2), dtype=jnp.float32) * 3.0
    t2 = jax.random.randint(k4, (N2,), 0, C2, dtype=jnp.int32)
    loss2 = focal_loss(x2, t2, alpha=0.25, gamma=2.0, size_average=True,
                       max_block_rows=32)
    jax.block_until_ready(loss2)
    ref2 = _reference_focal_loss(x2, t2, 0.25, 2.0, True)
    assert jnp.allclose(loss2, ref2, atol=2e-4, rtol=2e-3), (loss2, ref2)

    # Case 3: non-integer gamma (pow path) + sum reduction.
    loss3 = focal_loss(x2, t2, alpha=0.5, gamma=1.5, size_average=False,
                       max_block_rows=32)
    jax.block_until_ready(loss3)
    ref3 = _reference_focal_loss(x2, t2, 0.5, 1.5, False)
    assert jnp.allclose(loss3, ref3, atol=1e-2, rtol=2e-3), (loss3, ref3)

    print("KERNEL_OK")
</pallas_src>

<mosaic_0001>
module attributes {stable_mosaic.version = 11 : i64} {
  func.func @kernel(%arg0: i32, %arg1: memref<2x16x128xf32, #tpu.memory_space<vmem>>, %arg2: memref<16x128xi32, #tpu.memory_space<vmem>>, %arg3: memref<1x8x128xf32, #tpu.memory_space<vmem>>) attributes {dimension_semantics = [#tpu.dimension_semantics<parallel>], iteration_bounds = array<i64: 1>, scalar_prefetch = 0 : i64, scratch_operands = 0 : i64, tpu.core_type = #tpu.core_type<tc>, window_params = [{transform_indices = @transform_0, window_bounds = array<i64: 2, 16, 128>}, {transform_indices = @transform_1, window_bounds = array<i64: 16, 128>}, {transform_indices = @transform_2, window_bounds = array<i64: 1, 8, 128>}]} {
    %c0 = arith.constant 0 : index
    %c0_0 = arith.constant 0 : index
    %c0_1 = arith.constant 0 : index
    %0 = vector.load %arg1[%c0, %c0_0, %c0_1] : memref<2x16x128xf32, #tpu.memory_space<vmem>>, vector<2x16x128xf32>
    %c0_2 = arith.constant 0 : index
    %c0_3 = arith.constant 0 : index
    %1 = vector.load %arg2[%c0_2, %c0_3] : memref<16x128xi32, #tpu.memory_space<vmem>>, vector<16x128xi32>
    %cst = arith.constant dense<0xFF800000> : vector<16x128xf32>
    %2 = vector.multi_reduction <maximumf>, %0, %cst [0] : vector<2x16x128xf32> to vector<16x128xf32>
    %3 = vector.shape_cast %2 : vector<16x128xf32> to vector<1x16x128xf32>
    %4 = vector.broadcast %3 : vector<1x16x128xf32> to vector<2x16x128xf32>
    %5 = arith.subf %0, %4 : vector<2x16x128xf32>
    %6 = math.exp %5 : vector<2x16x128xf32>
    %cst_4 = arith.constant dense<0.000000e+00> : vector<16x128xf32>
    %7 = vector.multi_reduction <add>, %6, %cst_4 [0] : vector<2x16x128xf32> to vector<16x128xf32>
    %8 = tpu.iota {dimensions = array<i32: 0>} : vector<2x16x128xi32>
    %9 = vector.shape_cast %1 : vector<16x128xi32> to vector<1x16x128xi32>
    %10 = vector.broadcast %9 : vector<1x16x128xi32> to vector<2x16x128xi32>
    %11 = arith.cmpi eq, %8, %10 : vector<2x16x128xi32>
    %cst_5 = arith.constant 0.000000e+00 : f32
    %12 = vector.broadcast %cst_5 : f32 to vector<2x16x128xf32>
    %13 = arith.select %11, %0, %12 : vector<2x16x128xi1>, vector<2x16x128xf32>
    %cst_6 = arith.constant dense<0.000000e+00> : vector<16x128xf32>
    %14 = vector.multi_reduction <add>, %13, %cst_6 [0] : vector<2x16x128xf32> to vector<16x128xf32>
    %cst_7 = arith.constant 0.000000e+00 : f32
    %15 = vector.broadcast %cst_7 : f32 to vector<2x16x128xf32>
    %16 = arith.select %11, %6, %15 : vector<2x16x128xi1>, vector<2x16x128xf32>
    %cst_8 = arith.constant dense<0.000000e+00> : vector<16x128xf32>
    %17 = vector.multi_reduction <add>, %16, %cst_8 [0] : vector<2x16x128xf32> to vector<16x128xf32>
    %18 = vector.shape_cast %3 : vector<1x16x128xf32> to vector<16x128xf32>
    %19 = arith.subf %14, %18 : vector<16x128xf32>
    %20 = math.log %7 : vector<16x128xf32>
    %21 = arith.subf %19, %20 : vector<16x128xf32>
    %22 = tpu.reciprocal %7 {approx = true} : vector<16x128xf32> -> vector<16x128xf32>
    %23 = arith.mulf %17, %22 : vector<16x128xf32>
    %cst_9 = arith.constant 1.000000e+00 : f32
    %24 = vector.broadcast %cst_9 : f32 to vector<16x128xf32>
    %25 = arith.subf %24, %23 : vector<16x128xf32>
    %cst_10 = arith.constant 1.000000e+00 : f32
    %26 = vector.broadcast %cst_10 : f32 to vector<16x128xf32>
    %27 = arith.mulf %26, %25 : vector<16x128xf32>
    %28 = arith.mulf %27, %25 : vector<16x128xf32>
    %cst_11 = arith.constant -2.500000e-01 : f32
    %29 = vector.broadcast %cst_11 : f32 to vector<16x128xf32>
    %30 = arith.mulf %29, %28 : vector<16x128xf32>
    %31 = arith.mulf %30, %21 : vector<16x128xf32>
    %32 = tpu.iota {dimensions = array<i32: 0>} : vector<16x128xi32>
    %33 = tpu.iota {dimensions = array<i32: 1>} : vector<16x128xi32>
    %c16_i32 = arith.constant 16 : i32
    %34 = arith.muli %arg0, %c16_i32 : i32
    %35 = vector.broadcast %34 : i32 to vector<16x128xi32>
    %36 = arith.addi %35, %32 : vector<16x128xi32>
    %c128_i32 = arith.constant 128 : i32
    %37 = vector.broadcast %c128_i32 : i32 to vector<16x128xi32>
    %38 = arith.muli %36, %37 : vector<16x128xi32>
    %39 = arith.addi %38, %33 : vector<16x128xi32>
    %c8_i32 = arith.constant 8 : i32
    %40 = vector.broadcast %c8_i32 : i32 to vector<16x128xi32>
    %41 = arith.cmpi slt, %39, %40 : vector<16x128xi32>
    %cst_12 = arith.constant 0.000000e+00 : f32
    %42 = vector.broadcast %cst_12 : f32 to vector<16x128xf32>
    %43 = arith.select %41, %31, %42 : vector<16x128xi1>, vector<16x128xf32>
    %44 = vector.shape_cast %43 : vector<16x128xf32> to vector<2x8x128xf32>
    %cst_13 = arith.constant dense<0.000000e+00> : vector<8x128xf32>
    %45 = vector.multi_reduction <add>, %44, %cst_13 [0] : vector<2x8x128xf32> to vector<8x128xf32>
    %c0_14 = arith.constant 0 : index
    %c0_15 = arith.constant 0 : index
    %c0_16 = arith.constant 0 : index
    %46 = vector.load %arg3[%c0_14, %c0_15, %c0_16] : memref<1x8x128xf32, #tpu.memory_space<vmem>>, vector<1x8x128xf32>
    %47 = vector.shape_cast %46 : vector<1x8x128xf32> to vector<8x128xf32>
    %48 = vector.shape_cast %45 : vector<8x128xf32> to vector<1x8x128xf32>
    tpu.vector_store %arg3[%c0_14, %c0_15, %c0_16], %48 {strides = array<i32>} : memref<1x8x128xf32, #tpu.memory_space<vmem>>, vector<1x8x128xf32>,
    return
  }
  func.func @transform_0(%arg0: i32) -> (i32, i32, i32) {
    %c0_i32 = arith.constant 0 : i32
    %c0_i32_0 = arith.constant 0 : i32
    %c0_i32_1 = arith.constant 0 : i32
    return %c0_i32, %arg0, %c0_i32_0 : i32, i32, i32
  }
  func.func @transform_1(%arg0: i32) -> (i32, i32) {
    %c0_i32 = arith.constant 0 : i32
    %c0_i32_0 = arith.constant 0 : i32
    return %arg0, %c0_i32 : i32, i32
  }
  func.func @transform_2(%arg0: i32) -> (i32, i32, i32) {
    %c0_i32 = arith.constant 0 : i32
    %c0_i32_0 = arith.constant 0 : i32
    %c0_i32_1 = arith.constant 0 : i32
    return %arg0, %c0_i32, %c0_i32_0 : i32, i32, i32
  }
}

</mosaic_0001>

<bundles_post_ra>
// kernel: focal_loss.1
= control target key start
LH: loop header
LB: loop body
LE: loop exit
PB: predicated region body
PF: predicated region fallthrough
CT: control target
= control target key end

     0   :  { %v69_v22 = vlaneseq  ;;  %s154_s0 = inlined_call_operand.vmem [shape: f32[2,16,128], index: 0, kind: input, shape index: {}]   ;;  %s155_s1 = inlined_call_operand.vmem [shape: s32[16,128], index: 1, kind: input, shape index: {}]   ;;  %s156_s2 = inlined_call_operand.vmem [shape: f32[1,8,128], index: 2, kind: output, shape index: {}]  }
   0x1   :  { %v11_v0 = vld [vmem:[%s154_s0] sm:$0xff]  ;;  %v12_v1 = vld [vmem:[%s154_s0 + $0x8] sm:$0xff]  ;;  %v13_v2 = vld [vmem:[%s154_s0 + $0x10] sm:$0xff] }
   0x2   :  { %v14_v3 = vld [vmem:[%s154_s0 + $0x18] sm:$0xff]  ;;  %v135_v4 = vmax.f32 %v11_v0, %v13_v2  ;;  %v15_v20 = vld [vmem:[%s155_s1] sm:$0xff]  ;;  %v16_v21 = vld [vmem:[%s155_s1 + $0x8] sm:$0xff]  ;;  %v70_v23 = vshrl.u32 %v69_v22, 7  ;;  %v73_v40 = vand.u32 127, %v69_v22 }
   0x3   :  { %v137_v5 = vmax.f32 %v12_v1, %v14_v3  ;;  %vm33_vm0 = vcmp.eq.s32.totalorder %v15_v20, 0  ;;  %vm35_vm1 = vcmp.eq.s32.totalorder %v15_v20, 1  ;;  %vm34_vm2 = vcmp.eq.s32.totalorder %v16_v21, 0 }
   0x4   :  { %v19_v6 = vsub.f32 %v11_v0, %v135_v4  ;;  %v21_v7 = vsub.f32 %v13_v2, %v135_v4  ;;  %vm36_vm3 = vcmp.eq.s32.totalorder %v16_v21, 1  ;;  %v37_v24 = vsel %vm33_vm0, %v11_v0, 0.0 }
   0x5   :  { %v20_v8 = vsub.f32 %v12_v1, %v137_v5  ;;  %v22_v9 = vsub.f32 %v14_v3, %v137_v5  ;;  %v39_v25 = vsel %vm35_vm1, %v13_v2, 0.0  ;;  %v38_v28 = vsel %vm34_vm2, %v12_v1, 0.0 }
   0x6   :  { %v23_v10 = vmul.f32 1.442695, %v19_v6  ;;  %v27_v11 = vmul.f32 1.442695, %v21_v7  ;;  %v40_v29 = vsel %vm36_vm3, %v14_v3, 0.0  ;;  %v41_v32 = vadd.f32 %v39_v25, %v37_v24 }
   0x7   :  { %v25_v12 = vmul.f32 1.442695, %v20_v8  ;;  %v29_v13 = vmul.f32 1.442695, %v22_v9  ;;  %v71_v34 = vadd.s32 8, %v70_v23  ;;  %v42_v36 = vadd.f32 %v40_v29, %v38_v28 }
   0x8   :  { %92 = vpow2.f32 %v23_v10  ;;  %v78_v41 = vmul.u32 128, %v70_v23  ;;  %v49_v43 = vsub.f32 %v41_v32, %v135_v4 }
   0x9   :  { %94 = vpow2.f32 %v25_v12  ;;  %v79_v46 = vmul.u32 128, %v71_v34  ;;  %v50_v47 = vsub.f32 %v42_v36, %v137_v5 }
   0xa   :  { %96 = vpow2.f32 %v27_v11  ;;  %v80_v52 = vadd.s32 %v78_v41, %v73_v40 }
   0xb   :  { %98 = vpow2.f32 %v29_v13  ;;  %v81_v55 = vadd.s32 %v79_v46, %v73_v40 }
   0xc   :  { %vm82_vm4 = vcmp.lt.s32.totalorder %v80_v52, 8 }
   0xd   :  { %vm83_vm5 = vcmp.lt.s32.totalorder %v81_v55, 8 }
  0x15   :  { %v93_v14 = vpop.eup %92 }
  0x16   :  { %v95_v15 = vpop.eup %94  ;;  %v43_v26 = vsel %vm33_vm0, %v93_v14, 0.0 }
  0x17   :  { %v97_v16 = vpop.eup %96  ;;  %v44_v30 = vsel %vm34_vm2, %v95_v15, 0.0 }
  0x18   :  { %v99_v17 = vpop.eup %98  ;;  %v31_v18 = vadd.f32 %v97_v16, %v93_v14  ;;  %v45_v27 = vsel %vm35_vm1, %v97_v16, 0.0 }
  0x19   :  { %v32_v19 = vadd.f32 %v99_v17, %v95_v15  ;;  %v46_v31 = vsel %vm36_vm3, %v99_v17, 0.0  ;;  %v47_v33 = vadd.f32 %v45_v27, %v43_v26 }
  0x1a   :  { %100 = vlog2.f32 %v31_v18  ;;  %v48_v37 = vadd.f32 %v46_v31, %v44_v30 }
  0x1b   :  { %102 = vlog2.f32 %v32_v19 }
  0x1c   :  { %104 = vrcp.f32 %v31_v18 }
  0x1d   :  { %106 = vrcp.f32 %v32_v19 }
  0x27   :  { %v101_v35 = vpop.eup %100 }
  0x28   :  { %v103_v38 = vpop.eup %102  ;;  %v52_v44 = vmul.f32 0.6931472, %v101_v35 }
  0x29   :  { %v105_v39 = vpop.eup %104  ;;  %v54_v48 = vmul.f32 0.6931472, %v103_v38 }
  0x2a   :  { %v107_v42 = vpop.eup %106  ;;  %v59_v45 = vmul.f32 %v105_v39, %v47_v33  ;;  %v55_v53 = vsub.f32 %v49_v43, %v52_v44 }
  0x2b   :  { %v60_v49 = vmul.f32 %v107_v42, %v48_v37  ;;  %v56_v56 = vsub.f32 %v50_v47, %v54_v48 }
  0x2c   :  { %v61_v50 = vsub.f32 1.0, %v59_v45 }
  0x2d   :  { %v62_v51 = vsub.f32 1.0, %v60_v49 }
  0x2e   :  { %v63_v54 = vmul.f32 %v61_v50, %v61_v50 }
  0x2f   :  { %v64_v57 = vmul.f32 %v62_v51, %v62_v51 }
  0x30   :  { %v65_v58 = vmul.f32 -0.25, %v63_v54 }
  0x31   :  { %v66_v59 = vmul.f32 -0.25, %v64_v57 }
  0x32   :  { %v67_v60 = vmul.f32 %v65_v58, %v55_v53 }
  0x33   :  { %v68_v61 = vmul.f32 %v66_v59, %v56_v56 }
  0x34   :  { %v84_v62 = vsel %vm82_vm4, %v67_v60, 0.0 }
  0x35   :  { %v85_v63 = vsel %vm83_vm5, %v68_v61, 0.0 }
  0x36   :  { %v86_v0 = vadd.f32 %v85_v63, %v84_v62 }
  0x38   :  { %87 = vst [vmem:[%s156_s2] sm:$0xff] %v86_v0 }

</bundles_post_ra>
